<compile_context>
chip_gen: v5e
topology: v5e:2x2
jax: 0.10.0
libtpu: 0.0.40
codegen_flags: <defaults>
</compile_context>

<pallas_src>
import functools

import jax
import jax.numpy as jnp
from jax.experimental import pallas as pl
from jax.experimental.pallas import tpu as pltpu


_COMPILER_PARAMS = pltpu.CompilerParams(
    dimension_semantics=("parallel",),
    vmem_limit_bytes=32 * 1024 * 1024,
)

# Largest per-grid-step lane width (B_blk * L); sweep per generation, keep the
# resulting double-buffered footprint well under the scoped VMEM limit above.
_MAX_BLOCK_LANES = 16384


# ---------------------------------------------------------------------------
# In-kernel helpers
# ---------------------------------------------------------------------------

def _shift_masks(width, L, K):
    """Validity masks for 'same' zero padding, per sample segment.

    The lane axis holds B_blk samples of length L back to back; a shifted read
    h[:, l + d] is only valid while l stays inside its own sample.
    """
    lane_mod = jax.lax.broadcasted_iota(jnp.int32, (1, width), 1) % L
    pad = K // 2
    masks = []
    for k in range(K):
        d = k - pad
        if d == 0:
            masks.append(None)
        elif d > 0:
            masks.append(lane_mod < (L - d))
        else:
            masks.append(lane_mod >= (-d))
    return masks


def _conv1d_im2col(h, w_flat, masks, K):
    """'Same'-padded stride-1 Conv1d as a single MXU matmul.

    h:      (C_in, W) activation slab (W = B_blk*L, samples along lanes).
    w_flat: (C_out, K*C_in) weights, row order k*C_in + ci.
    Returns (C_out, W) float32.
    """
    _, W = h.shape
    pad = K // 2
    pieces = []
    for k in range(K):
        d = k - pad                                   # out[:, l] reads h[:, l + d]
        if d == 0:
            pieces.append(h)
        else:
            hk = pltpu.roll(h, shift=(-d) % W, axis=1)   # non-negative shift (== jnp.roll(h, -d))
            pieces.append(jnp.where(masks[k], hk, 0.0))
    im2col = jnp.concatenate(pieces, axis=0)          # (K*C_in, W)
    return jnp.dot(w_flat, im2col, preferred_element_type=jnp.float32)


# ---------------------------------------------------------------------------
# Kernels
# ---------------------------------------------------------------------------

def _basic_unit_kernel(x_ref, bn_ref, w0_ref, w1_ref, o_ref, *, K, L):
    x = x_ref[...]                                    # (C, W)
    masks = _shift_masks(x.shape[-1], L, K)           # hoisted, shared by both convs
    s0, b0, s1, b1 = bn_ref[0], bn_ref[1], bn_ref[2], bn_ref[3]   # each (C, 1)
    h0 = jnp.maximum(x * s0 + b0, 0.0)                # norm_0 + act_0
    y0 = _conv1d_im2col(h0, w0_ref[...], masks, K)    # conv_0
    h1 = jnp.maximum(y0 * s1 + b1, 0.0)               # norm_1 + act_1 (+dropout: identity)
    y1 = _conv1d_im2col(h1, w1_ref[...], masks, K)    # conv_1
    o_ref[...] = (x + y1).astype(o_ref.dtype)         # residual add


def _downsample_pre_kernel(x_ref, bn_ref, w0_ref, wds_ref, y0_ref, d_ref, *, K, L):
    """norm_act + stride-1 part of DownsampleUnit conv_0 and the 1x1 downsample.

    The wrapper subsamples both outputs by `stride` (equivalent to the strided
    convs for odd kernel_size with padding K//2 resp. 0).
    """
    x = x_ref[...]                                    # (C_in, W)
    masks = _shift_masks(x.shape[-1], L, K)
    s, b = bn_ref[0], bn_ref[1]
    h = jnp.maximum(x * s + b, 0.0)                   # norm_act
    y0_ref[...] = _conv1d_im2col(h, w0_ref[...], masks, K).astype(y0_ref.dtype)
    d_ref[...] = jnp.dot(wds_ref[...], h,
                         preferred_element_type=jnp.float32).astype(d_ref.dtype)


def _downsample_post_kernel(y0_ref, d_ref, bn_ref, w1_ref, o_ref, *, K, L):
    y0 = y0_ref[...]                                  # (C_out, W_out)
    masks = _shift_masks(y0.shape[-1], L, K)
    s, b = bn_ref[0], bn_ref[1]
    h = jnp.maximum(y0 * s + b, 0.0)                  # norm_0 + act_0 (+dropout: identity)
    y1 = _conv1d_im2col(h, w1_ref[...], masks, K)     # conv_1
    o_ref[...] = (d_ref[...] + y1).astype(o_ref.dtype)   # downsample(x) + residual


# ---------------------------------------------------------------------------
# Wrapper glue
# ---------------------------------------------------------------------------

def _choose_bblk(n_samples, L, max_lanes=_MAX_BLOCK_LANES):
    """Samples per grid step: largest divisor of n_samples whose lane width is a
    multiple of 128 and fits the budget, preferring to keep >= 2 grid steps."""
    valid = [b for b in range(1, n_samples + 1)
             if n_samples % b == 0 and (b * L) % 128 == 0 and b * L <= max_lanes]
    if not valid:
        return n_samples                              # block == full array is always legal
    two_step = [b for b in valid if n_samples // b >= 2]
    return max(two_step) if two_step else max(valid)


def _act_spec(C, lanes):
    return pl.BlockSpec((C, lanes), lambda i: (0, i))


def _const_spec(shape):
    zeros = (0,) * len(shape)
    return pl.BlockSpec(shape, lambda i: zeros)


def _fold_bn(gamma, beta, mean, var, eps=1e-5):
    scale = gamma / jnp.sqrt(var + eps)
    return scale, beta - mean * scale


def _pack_bn(*scale_shift_pairs):
    rows = []
    for s, b in scale_shift_pairs:
        rows.extend([s, b])
    return jnp.stack(rows, axis=0)[:, :, None]        # (2n, C, 1)


def _flatten_conv_w(w):
    """(C_out, C_in, K) -> (C_out, K*C_in) im2col layout (row order k*C_in + ci)."""
    c_out, c_in, k = w.shape
    return jnp.transpose(w, (0, 2, 1)).reshape(c_out, k * c_in)


def _basic_unit(x2d, bn, w0f, w1f, n_samples, L):
    C, W = x2d.shape
    K = w0f.shape[1] // C
    B = _choose_bblk(n_samples, L)
    return pl.pallas_call(
        functools.partial(_basic_unit_kernel, K=K, L=L),
        out_shape=jax.ShapeDtypeStruct((C, W), jnp.float32),
        grid_spec=pltpu.PrefetchScalarGridSpec(
            num_scalar_prefetch=0,
            grid=(n_samples // B,),
            in_specs=[_act_spec(C, B * L), _const_spec(bn.shape),
                      _const_spec(w0f.shape), _const_spec(w1f.shape)],
            out_specs=_act_spec(C, B * L)),
        compiler_params=_COMPILER_PARAMS,
    )(x2d, bn, w0f, w1f)


def _downsample_pre(x2d, bn, w0f, wdsf, n_samples, L):
    C_in, W = x2d.shape
    C_out = w0f.shape[0]
    K = w0f.shape[1] // C_in
    B = _choose_bblk(n_samples, L)
    return pl.pallas_call(
        functools.partial(_downsample_pre_kernel, K=K, L=L),
        out_shape=(jax.ShapeDtypeStruct((C_out, W), jnp.float32),
                   jax.ShapeDtypeStruct((C_out, W), jnp.float32)),
        grid_spec=pltpu.PrefetchScalarGridSpec(
            num_scalar_prefetch=0,
            grid=(n_samples // B,),
            in_specs=[_act_spec(C_in, B * L), _const_spec(bn.shape),
                      _const_spec(w0f.shape), _const_spec(wdsf.shape)],
            out_specs=(_act_spec(C_out, B * L), _act_spec(C_out, B * L))),
        compiler_params=_COMPILER_PARAMS,
    )(x2d, bn, w0f, wdsf)


def _downsample_post(y02d, d2d, bn, w1f, n_samples, L):
    C_out, W = y02d.shape
    K = w1f.shape[1] // C_out
    B = _choose_bblk(n_samples, L)
    return pl.pallas_call(
        functools.partial(_downsample_post_kernel, K=K, L=L),
        out_shape=jax.ShapeDtypeStruct((C_out, W), jnp.float32),
        grid_spec=pltpu.PrefetchScalarGridSpec(
            num_scalar_prefetch=0,
            grid=(n_samples // B,),
            in_specs=[_act_spec(C_out, B * L), _act_spec(C_out, B * L),
                      _const_spec(bn.shape), _const_spec(w1f.shape)],
            out_specs=_act_spec(C_out, B * L)),
        compiler_params=_COMPILER_PARAMS,
    )(y02d, d2d, bn, w1f)


def block_forward(x, params):
    """Eval-mode forward of Block (DownsampleUnit + depth*BasicUnit), shake_shake=False.

    x: (N, C_in, L) float32 -> (N, C_out, L_out) float32.
    """
    N, C_in, L = x.shape
    down = params["down"]
    stride = int(down["stride"])
    C_out, _, K = down["w0"].shape
    assert K % 2 == 1, "kernel_size must be odd for 'same' padding"

    # Channels on sublanes, samples concatenated along lanes (one XLA transpose).
    x2d = jnp.transpose(x, (1, 0, 2)).reshape(C_in, N * L)

    # ---- DownsampleUnit ----
    bn_na = _pack_bn(_fold_bn(down["gamma_na"], down["beta_na"],
                              down["mean_na"], down["var_na"]))
    y0_full, d_full = _downsample_pre(x2d, bn_na, _flatten_conv_w(down["w0"]),
                                      down["w_ds"][:, :, 0], N, L)
    # Stride subsampling (layout glue; equals PyTorch strided conv for odd K).
    L_out = (L - 1) // stride + 1
    y0 = y0_full.reshape(C_out, N, L)[:, :, ::stride].reshape(C_out, N * L_out)
    d = d_full.reshape(C_out, N, L)[:, :, ::stride].reshape(C_out, N * L_out)

    bn_d1 = _pack_bn(_fold_bn(down["gamma1"], down["beta1"],
                              down["mean1"], down["var1"]))
    h2d = _downsample_post(y0, d, bn_d1, _flatten_conv_w(down["w1"]), N, L_out)

    # ---- depth x BasicUnit ----
    for u in params["units"]:
        bn = _pack_bn(_fold_bn(u["gamma0"], u["beta0"], u["mean0"], u["var0"]),
                      _fold_bn(u["gamma1"], u["beta1"], u["mean1"], u["var1"]))
        h2d = _basic_unit(h2d, bn, _flatten_conv_w(u["w0"]),
                          _flatten_conv_w(u["w1"]), N, L_out)

    return jnp.transpose(h2d.reshape(C_out, N, L_out), (1, 0, 2))


# ---------------------------------------------------------------------------
# Pure-JAX reference (eval mode) and parameter construction
# ---------------------------------------------------------------------------

def _conv1d_ref(x, w, stride, pad):
    return jax.lax.conv_general_dilated(
        x, w, window_strides=(stride,), padding=[(pad, pad)],
        dimension_numbers=("NCH", "OIH", "NCH"))


def _bn_relu_ref(x, gamma, beta, mean, var, eps=1e-5):
    scale = gamma / jnp.sqrt(var + eps)
    shift = beta - mean * scale
    return jnp.maximum(x * scale[None, :, None] + shift[None, :, None], 0.0)


def block_forward_ref(x, params):
    down = params["down"]
    K = down["w0"].shape[-1]
    pad, stride = K // 2, int(down["stride"])
    h = _bn_relu_ref(x, down["gamma_na"], down["beta_na"], down["mean_na"], down["var_na"])
    r = _conv1d_ref(h, down["w0"], stride, pad)
    r = _bn_relu_ref(r, down["gamma1"], down["beta1"], down["mean1"], down["var1"])
    r = _conv1d_ref(r, down["w1"], 1, pad)
    out = _conv1d_ref(h, down["w_ds"], stride, 0) + r
    for u in params["units"]:
        t = _bn_relu_ref(out, u["gamma0"], u["beta0"], u["mean0"], u["var0"])
        t = _conv1d_ref(t, u["w0"], 1, pad)
        t = _bn_relu_ref(t, u["gamma1"], u["beta1"], u["mean1"], u["var1"])
        t = _conv1d_ref(t, u["w1"], 1, pad)
        out = out + t
    return out


def _rand_bn(key, c):
    k = jax.random.split(key, 4)
    return (jax.random.normal(k[0], (c,), jnp.float32) * 0.1 + 1.0,   # gamma
            jax.random.normal(k[1], (c,), jnp.float32) * 0.1,         # beta
            jax.random.normal(k[2], (c,), jnp.float32) * 0.1,         # running_mean
            jax.random.uniform(k[3], (c,), jnp.float32, 0.5, 1.5))    # running_var


def make_block_params(key, in_channels, out_channels, stride, depth, kernel_size):
    C_in, C_out, K = in_channels, out_channels, kernel_size
    keys = jax.random.split(key, 5 + 5 * depth)
    g_na, b_na, m_na, v_na = _rand_bn(keys[0], C_in)
    g1, b1, m1, v1 = _rand_bn(keys[1], C_out)
    down = dict(
        gamma_na=g_na, beta_na=b_na, mean_na=m_na, var_na=v_na,
        w0=jax.random.normal(keys[2], (C_out, C_in, K), jnp.float32) * 0.1,
        gamma1=g1, beta1=b1, mean1=m1, var1=v1,
        w1=jax.random.normal(keys[3], (C_out, C_out, K), jnp.float32) * 0.1,
        w_ds=jax.random.normal(keys[4], (C_out, C_in, 1), jnp.float32) * 0.1,
        stride=stride)
    units = []
    for di in range(depth):
        ku = keys[5 + 5 * di: 10 + 5 * di]
        g0, b0, m0, v0 = _rand_bn(ku[0], C_out)
        g1u, b1u, m1u, v1u = _rand_bn(ku[1], C_out)
        units.append(dict(
            gamma0=g0, beta0=b0, mean0=m0, var0=v0,
            w0=jax.random.normal(ku[2], (C_out, C_out, K), jnp.float32) * 0.1,
            gamma1=g1u, beta1=b1u, mean1=m1u, var1=v1u,
            w1=jax.random.normal(ku[3], (C_out, C_out, K), jnp.float32) * 0.1))
    return dict(down=down, units=units)


if __name__ == "__main__":
    # Small, tiling-friendly Block: 8 -> 16 channels, stride 2, depth-2 tail.
    N, C_IN, C_OUT, L, K = 4, 8, 16, 128, 3
    STRIDE, DEPTH = 2, 2

    key = jax.random.PRNGKey(0)
    kx, kp = jax.random.split(key)
    x = jax.random.normal(kx, (N, C_IN, L), jnp.float32)
    params = make_block_params(kp, C_IN, C_OUT, STRIDE, DEPTH, K)

    out = jax.block_until_ready(block_forward(x, params))

    L_OUT = (L - 1) // STRIDE + 1
    assert out.shape == (N, C_OUT, L_OUT) and out.dtype == jnp.float32

    ref = block_forward_ref(x, params)
    max_err = float(jnp.max(jnp.abs(out - ref)))
    assert max_err < 1e-3, f"kernel vs reference mismatch: max abs err {max_err}"
    print("KERNEL_OK")
</pallas_src>

<mosaic_0001>
module attributes {stable_mosaic.version = 11 : i64} {
  func.func @_downsample_pre_kernel(%arg0: i32, %arg1: memref<8x256xf32, #tpu.memory_space<vmem>>, %arg2: memref<2x8x1xf32, #tpu.memory_space<vmem>>, %arg3: memref<16x24xf32, #tpu.memory_space<vmem>>, %arg4: memref<16x8xf32, #tpu.memory_space<vmem>>, %arg5: memref<16x256xf32, #tpu.memory_space<vmem>>, %arg6: memref<16x256xf32, #tpu.memory_space<vmem>>) attributes {dimension_semantics = [#tpu.dimension_semantics<parallel>], iteration_bounds = array<i64: 2>, scalar_prefetch = 0 : i64, scratch_operands = 0 : i64, tpu.core_type = #tpu.core_type<tc>, window_params = [{transform_indices = @transform_0, window_bounds = array<i64: 8, 256>}, {pipeline_mode = #tpu.pipeline_mode<synchronous>, transform_indices = @transform_1, window_bounds = array<i64: 2, 8, 1>}, {pipeline_mode = #tpu.pipeline_mode<synchronous>, transform_indices = @transform_2, window_bounds = array<i64: 16, 24>}, {pipeline_mode = #tpu.pipeline_mode<synchronous>, transform_indices = @transform_3, window_bounds = array<i64: 16, 8>}, {transform_indices = @transform_4, window_bounds = array<i64: 16, 256>}, {transform_indices = @transform_5, window_bounds = array<i64: 16, 256>}]} {
    %c0 = arith.constant 0 : index
    %c0_0 = arith.constant 0 : index
    %0 = vector.load %arg1[%c0, %c0_0] : memref<8x256xf32, #tpu.memory_space<vmem>>, vector<8x256xf32>
    %1 = tpu.iota {dimensions = array<i32: 1>} : vector<1x256xi32>
    %c128_i32 = arith.constant 128 : i32
    %c0_i32 = arith.constant 0 : i32
    %2 = arith.cmpi eq, %c128_i32, %c0_i32 : i32
    %c1_i32 = arith.constant 1 : i32
    %3 = arith.select %2, %c1_i32, %c128_i32 : i32
    %4 = vector.broadcast %3 : i32 to vector<1x256xi32>
    %5 = arith.remsi %1, %4 : vector<1x256xi32>
    %c0_i32_1 = arith.constant 0 : i32
    %6 = vector.broadcast %c0_i32_1 : i32 to vector<1x256xi32>
    %7 = arith.cmpi ne, %5, %6 : vector<1x256xi32>
    %c0_i32_2 = arith.constant 0 : i32
    %8 = vector.broadcast %c0_i32_2 : i32 to vector<1x256xi32>
    %9 = arith.cmpi slt, %5, %8 : vector<1x256xi32>
    %c0_i32_3 = arith.constant 0 : i32
    %10 = arith.cmpi slt, %3, %c0_i32_3 : i32
    %11 = vector.broadcast %10 : i1 to vector<1x256xi1>
    %12 = vector.broadcast %11 : vector<1x256xi1> to vector<1x256xi1>
    %13 = arith.xori %9, %12 : vector<1x256xi1>
    %14 = arith.andi %13, %7 : vector<1x256xi1>
    %15 = vector.broadcast %3 : i32 to vector<1x256xi32>
    %16 = arith.addi %5, %15 : vector<1x256xi32>
    %17 = arith.select %14, %16, %5 : vector<1x256xi1>, vector<1x256xi32>
    %c1_i32_4 = arith.constant 1 : i32
    %18 = vector.broadcast %c1_i32_4 : i32 to vector<1x256xi32>
    %19 = arith.cmpi sge, %17, %18 : vector<1x256xi32>
    %c127_i32 = arith.constant 127 : i32
    %20 = vector.broadcast %c127_i32 : i32 to vector<1x256xi32>
    %21 = arith.cmpi slt, %17, %20 : vector<1x256xi32>
    %c0_5 = arith.constant 0 : index
    %c0_6 = arith.constant 0 : index
    %c0_7 = arith.constant 0 : index
    %22 = vector.load %arg2[%c0_5, %c0_6, %c0_7] : memref<2x8x1xf32, #tpu.memory_space<vmem>>, vector<1x8x1xf32>
    %23 = vector.shape_cast %22 : vector<1x8x1xf32> to vector<8x1xf32>
    %c1 = arith.constant 1 : index
    %c0_8 = arith.constant 0 : index
    %c0_9 = arith.constant 0 : index
    %24 = vector.load %arg2[%c1, %c0_8, %c0_9] : memref<2x8x1xf32, #tpu.memory_space<vmem>>, vector<1x8x1xf32>
    %25 = vector.shape_cast %24 : vector<1x8x1xf32> to vector<8x1xf32>
    %26 = vector.broadcast %23 : vector<8x1xf32> to vector<8x256xf32>
    %27 = arith.mulf %0, %26 : vector<8x256xf32>
    %28 = vector.broadcast %25 : vector<8x1xf32> to vector<8x256xf32>
    %29 = arith.addf %27, %28 : vector<8x256xf32>
    %cst = arith.constant 0.000000e+00 : f32
    %30 = vector.broadcast %cst : f32 to vector<8x256xf32>
    %31 = arith.maximumf %29, %30 : vector<8x256xf32>
    %c0_10 = arith.constant 0 : index
    %c0_11 = arith.constant 0 : index
    %32 = vector.load %arg3[%c0_10, %c0_11] : memref<16x24xf32, #tpu.memory_space<vmem>>, vector<16x24xf32>
    %c1_i32_12 = arith.constant 1 : i32
    %33 = tpu.dynamic_rotate %31 by %c1_i32_12 dim 1 : vector<8x256xf32>, i32 -> vector<8x256xf32>
    %cst_13 = arith.constant 0.000000e+00 : f32
    %34 = vector.shape_cast %19 : vector<1x256xi1> to vector<1x256xi1>
    %35 = vector.broadcast %34 : vector<1x256xi1> to vector<8x256xi1>
    %36 = vector.broadcast %cst_13 : f32 to vector<8x256xf32>
    %37 = arith.select %35, %33, %36 : vector<8x256xi1>, vector<8x256xf32>
    %c255_i32 = arith.constant 255 : i32
    %38 = tpu.dynamic_rotate %31 by %c255_i32 dim 1 : vector<8x256xf32>, i32 -> vector<8x256xf32>
    %cst_14 = arith.constant 0.000000e+00 : f32
    %39 = vector.shape_cast %21 : vector<1x256xi1> to vector<1x256xi1>
    %40 = vector.broadcast %39 : vector<1x256xi1> to vector<8x256xi1>
    %41 = vector.broadcast %cst_14 : f32 to vector<8x256xf32>
    %42 = arith.select %40, %38, %41 : vector<8x256xi1>, vector<8x256xf32>
    %43 = tpu.concatenate %37, %31, %42 in 0 : vector<8x256xf32>, vector<8x256xf32>, vector<8x256xf32> -> vector<24x256xf32>
    %cst_15 = arith.constant dense<0.000000e+00> : vector<16x256xf32>
    %44 = tpu.matmul %32, %43, %cst_15 {dimension_numbers = #tpu.dot_dimension_numbers<[1], [0], [0], [1], [0, 0, 1, 1], [], []>} : vector<16x24xf32>, vector<24x256xf32>, vector<16x256xf32> -> vector<16x256xf32>
    %c0_16 = arith.constant 0 : index
    %c0_17 = arith.constant 0 : index
    %45 = vector.load %arg5[%c0_16, %c0_17] : memref<16x256xf32, #tpu.memory_space<vmem>>, vector<16x256xf32>
    tpu.vector_store %arg5[%c0_16, %c0_17], %44 {strides = array<i32>} : memref<16x256xf32, #tpu.memory_space<vmem>>, vector<16x256xf32>,
    %c0_18 = arith.constant 0 : index
    %c0_19 = arith.constant 0 : index
    %46 = vector.load %arg4[%c0_18, %c0_19] : memref<16x8xf32, #tpu.memory_space<vmem>>, vector<16x8xf32>
    %cst_20 = arith.constant dense<0.000000e+00> : vector<16x256xf32>
    %47 = tpu.matmul %46, %31, %cst_20 {dimension_numbers = #tpu.dot_dimension_numbers<[1], [0], [0], [1], [0, 0, 1, 1], [], []>} : vector<16x8xf32>, vector<8x256xf32>, vector<16x256xf32> -> vector<16x256xf32>
    %c0_21 = arith.constant 0 : index
    %c0_22 = arith.constant 0 : index
    %48 = vector.load %arg6[%c0_21, %c0_22] : memref<16x256xf32, #tpu.memory_space<vmem>>, vector<16x256xf32>
    tpu.vector_store %arg6[%c0_21, %c0_22], %47 {strides = array<i32>} : memref<16x256xf32, #tpu.memory_space<vmem>>, vector<16x256xf32>,
    return
  }
  func.func @transform_0(%arg0: i32) -> (i32, i32) {
    %c0_i32 = arith.constant 0 : i32
    %c0_i32_0 = arith.constant 0 : i32
    return %c0_i32, %arg0 : i32, i32
  }
  func.func @transform_1(%arg0: i32) -> (i32, i32, i32) {
    %c0_i32 = arith.constant 0 : i32
    %c0_i32_0 = arith.constant 0 : i32
    %c0_i32_1 = arith.constant 0 : i32
    %c0_i32_2 = arith.constant 0 : i32
    return %c0_i32, %c0_i32_0, %c0_i32_1 : i32, i32, i32
  }
  func.func @transform_2(%arg0: i32) -> (i32, i32) {
    %c0_i32 = arith.constant 0 : i32
    %c0_i32_0 = arith.constant 0 : i32
    %c0_i32_1 = arith.constant 0 : i32
    return %c0_i32, %c0_i32_0 : i32, i32
  }
  func.func @transform_3(%arg0: i32) -> (i32, i32) {
    %c0_i32 = arith.constant 0 : i32
    %c0_i32_0 = arith.constant 0 : i32
    %c0_i32_1 = arith.constant 0 : i32
    return %c0_i32, %c0_i32_0 : i32, i32
  }
  func.func @transform_4(%arg0: i32) -> (i32, i32) {
    %c0_i32 = arith.constant 0 : i32
    %c0_i32_0 = arith.constant 0 : i32
    return %c0_i32, %arg0 : i32, i32
  }
  func.func @transform_5(%arg0: i32) -> (i32, i32) {
    %c0_i32 = arith.constant 0 : i32
    %c0_i32_0 = arith.constant 0 : i32
    return %c0_i32, %arg0 : i32, i32
  }
}

</mosaic_0001>

<bundles_post_ra>
// kernel: tpu_custom_call.1
= control target key start
LH: loop header
LB: loop body
LE: loop exit
PB: predicated region body
PF: predicated region fallthrough
CT: control target
= control target key end

     0   :  { %11 = vsyncpa [#allocation3], 0  ;;  %s1000_s0 = inlined_call_operand.vmem [shape: f32[8,512], index: 0, kind: input, shape index: {}]   ;;  %s1001_s1 = inlined_call_operand.vmem [shape: f32[2,8,1], index: 1, kind: input, shape index: {}]   ;;  %s1002_s2 = inlined_call_operand.hbm [shape: f32[16,24], index: 2, kind: input, shape index: {}]   ;;  %s1003_s3 = inlined_call_operand.vmem [shape: f32[16,8], index: 3, kind: input, shape index: {}]   ;;  %s1004_s4 = inlined_call_operand.hbm [shape: f32[16,512], index: 4, kind: output, shape index: {0}]   ;;  %s1005_s5 = inlined_call_operand.hbm [shape: f32[16,512], index: 5, kind: output, shape index: {1}]  }
   0x1   :  { %12 = vsyncpa [#allocation4], 0 }
   0x2   :  { %14 = vsyncpa [#allocation4 + $0x1], 0 }
   0x3   :  { %15 = vsyncpa [#allocation7], 0 }
   0x4   :  { %17 = vsyncpa [#allocation7 + $0x1], 0  ;;  %s862_s18 = smov 0   ;;  %s864_s19 = smov 0  }
   0x5   :  { %s866_s20 = smov 0   ;;  %s868_s21 = smov 0  }
   0x6 LB: > { %s883_s22 = sadd.s32 4294967295, %s821_s21   ;;  %s596_s23 = sadd.s32 4294967294, %s821_s21   ;;  %s821_s21 = sphi %s868_s21, %s1011_s21   ;;  %s817_s20 = sphi %s866_s20, %s1010_s20   ;;  %s813_s19 = sphi %s864_s19, %s1009_s19   ;;  %s809_s18 = sphi %s862_s18, %s1008_s18  }
   0x7   : > { %s887_s24 = sadd.s32 1, %s821_s21   ;;  %s119_s25 = sadd.s32 1, %s817_s20 }
   0x8   : > { %s116_s26 = ssub.s32 %s821_s21, %s887_s24  ;;  %p129_p0 = scmp.ne.s32.totalorder %s817_s20, %s813_s19 }
   0x9   : > { %p117_p1 = scmp.eq.s32.totalorder %s116_s26, 0  ;;  %p130_p2 = scmp.eq.s32.totalorder %s883_s22, 1 }
   0xa   : > { %p135_p3 = scmp.ne.s32.totalorder %s813_s19, %s809_s18  ;;  %p136_p4 = scmp.eq.s32.totalorder %s596_s23, 1 }
   0xb   : > { %s898_s27 = scalar_select %p117_p1, %s817_s20, %s119_s25  }
   0xc   : > { %p900_p5 = por %p130_p2, %p129_p0  ;;  %p904_p6 = por %p136_p4, %p135_p3 }
   0xd   : > { %p597_p7 = scmp.ge.s32.totalorder %s821_s21, 1  ;;  %p169_p8 = scmp.lt.s32.totalorder %s821_s21, 3 }
   0xe   : > { %p648_p9 = scmp.eq.s32.totalorder %s883_s22, 0  ;;  %s183_s7 = sshll.u32 %s1002_s2, 4  ;;  %s184_s7 = int_to_ptr.hbm [resolvable:$true] %s183_s7 }
   0xf   : > { %p170_p10 = pnand %p597_p7, %p169_p8  ;;  %s823_s8 = smov [#allocation2]  }
  0x10   : > { %s185_s9 = sshll.u32 %s823_s8, 4  ;;  %s824_s10 = smov 128   ;;  %s186_s9 = int_to_ptr.vmem [resolvable:$true] %s185_s9 }
  0x11   : > { %p637_p11 = pneg %p170_p10  ;;  %s825_s11 = smov 8  }
  0x12   : > { %213 = sbr.rel (%p170_p10) target bundleno = 421 (0x1a5), region = 36 }
  0x13   : > { %p638_p12 = pnand %p648_p9, %p637_p11 }
  0x15   : > { %640 = dma.hbm_to_vmem [thread:$0]  (!%p638_p12), %s184_s7, 256, %s186_s9, [#allocation3], %s824_s10, %s824_s10, %s825_s11  }
  0x17   : > { %796 = dma.done.wait (%p648_p9), [#allocation3], 256  }
  0x18   : > { %798 = vsyncadd (%p648_p9), [#allocation3], 4294967040  ;;  %v826_v0 = vmov 0   ;;  %v288_v1 = vld [vmem:[%s1001_s1] sm:$0xff]  ;;  %v606_v2 = vld [vmem:[%s1001_s1 + $0x8] sm:$0xff]  ;;  %s604_s16 = sshll.u32 %s883_s22, 1  ;;  %v257_v15 = vlaneseq }
  0x19   : > { %692 = vset.pattern.permute.xlu0 %v826_v0  ;;  %p248_p13 = scmp.lt.s32.totalorder %s604_s16, 3  ;;  %s827_s30 = smov 1   ;;  %v392_v13 = vld [vmem:[%s1003_s3] sm:$0xff]  ;;  %vm394_vm0 = vcmask 64512   ;;  %v393_v14 = vld [vmem:[%s1003_s3 + $0x8] sm:$0xff]  ;;  %vm335_vm6 = vcmask 195584  }
  0x1a   : > { %293 = vperm.xlu0 %692, %v288_v1   ;;  %s828_s6 = smov 127   ;;  %v258_v16 = vand.u32 127, %v257_v15  ;;  %v307_v25 = vld [vmem:[#allocation2] sm:$0xff]  ;;  %v308_v28 = vld [vmem:[#allocation2 + $0x8] sm:$0xff]  ;;  %s937_s11 = sand.u32 1, %s813_s19  }
  0x1b   : > { %s1013_s16 = smov (!%p248_p13, %s604_s16), 3  ;;  %s602_s12 = sshll.u32 %s937_s11, 5 }
  0x1c   : > { %s605_s17 = sshll.u32 %s1013_s16, 3  ;;  %v259_v17 = vadd.s32 128, %v258_v16  ;;  %vm286_vm1 = vcmp.lt.s32.totalorder %v258_v16, 127  ;;  %vm313_vm3 = vcmp.lt.s32.totalorder %v258_v16, 1  ;;  %vm284_vm4 = vcmp.ge.s32.totalorder %v258_v16, 1  ;;  %s627_s13 = sshll.u32 %s883_s22, 4 }
  0x1d   : > { %s251_s26 = scalar_lea.vmem %s1000_s0, %s605_s17  ;;  %s246_s14 = scalar_lea.vmem [#allocation6], %s602_s12 }
  0x1e   : > { %v255_v4 = vld [vmem:[%s251_s26] sm:$0xff]  ;;  %v256_v5 = vld [vmem:[%s251_s26 + $0x8] sm:$0xff]  ;;  %v271_v20 = vand.u32 127, %v259_v17  ;;  %s485_s17 = scalar_lea.hbm %s1005_s5, %s627_s13  ;;  %s486_s23 = sshll.u32 %s246_s14, 4  ;;  %s487_s23 = int_to_ptr.vmem [resolvable:$true] %s486_s23 }
  0x1f   : > { %s488_s25 = sshll.u32 %s485_s17, 4  ;;  %s457_s26 = scalar_lea.sflag [#allocation7], %s937_s11  ;;  %s489_s25 = int_to_ptr.hbm [resolvable:$true] %s488_s25 }
  0x20   : > { %vm287_vm2 = vcmp.lt.s32.totalorder %v271_v20, 127  ;;  %vm285_vm5 = vcmp.ge.s32.totalorder %v271_v20, 1  ;;  %s743_s9 = scalar_lea.hbm %s1005_s5, 64 }
  0x22   : > { %300 = vperm.xlu0 %692, %v606_v2  }
  0x8c   : > { %v294_v3 = vpop.permute.xlu0 %293 }
  0x8d   : > { %v296_v6 = vmul.f32 %v294_v3, %v255_v4  ;;  %v297_v7 = vmul.f32 %v294_v3, %v256_v5 }
  0x94   : > { %v301_v8 = vpop.permute.xlu0 %300 }
  0x95   : > { %v303_v9 = vadd.f32 %v301_v8, %v296_v6  ;;  %v304_v10 = vadd.f32 %v301_v8, %v297_v7 }
  0x97   : > { %v305_v11 = vmax.f32 %v303_v9, 0.0  ;;  %v306_v12 = vmax.f32 %v304_v10, 0.0 }
  0x99   : > { %439 = vmatpush.msra.mxu3 %v306_v12  ;;  %309 = vrot.lane.b32.xlu2 %v305_v11, %s827_s30 }
  0x9a   : > { %322 = vrot.lane.b32.xlu1 %v305_v11, %s828_s6  ;;  %416 = vmatpush.msra.mxu2 %v305_v11 }
  0x9b   : > { %615 = vmatmul.msk.f32.vlgmr.msra.gmra.mxu2 %vm394_vm0, %v392_v13  ;;  %617 = vmatmul.msk.f32.vlgmr.msra.gmra.mxu3 %vm394_vm0, %v392_v13 }
  0xa1   : > { %311 = vrot.lane.b32.xlu2 %v306_v12, %s827_s30  ;;  %s737_s30 = sshra.s32 %s489_s25, 4  ;;  %s738_s30 = int_to_ptr.hbm [resolvable:$true] %s737_s30 }
  0xa2   : > { %324 = vrot.lane.b32.xlu1 %v306_v12, %s828_s6  ;;  %s739_s6 = scalar_lea.hbm %s738_s30, 32  ;;  %p744_p3 = scmp.lt.s32.totalorder %s738_s30, %s1005_s5 }
  0xa3   : > { %616 = vmatmul.msk.f32.gmra.mxu2 %vm394_vm0, %v393_v14  ;;  %618 = vmatmul.msk.f32.gmra.mxu3 %vm394_vm0, %v393_v14  ;;  %p740_p0 = scmp.ne.s32.totalorder %s738_s30, %s739_s6  ;;  %p745_p4 = scmp.lt.s32.totalorder %s743_s9, %s739_s6 }
  0xa5   : > { %p741_p1 = pnand %p740_p0, %p900_p5  ;;  %p746_p7 = por %p745_p4, %p744_p3 }
  0xa7   : > { %p742_p2 = pneg %p741_p1 }
  0xa9   : > { %p747_p8 = pnand %p746_p7, %p742_p2 }
  0xf3   : > { %v310_v18 = vpop.permute.xlu2 %309 }
  0xfb   : > { %v312_v24 = vpop.permute.xlu2 %311 }
  0xfc   : > { %v315_v26 = vsel %vm313_vm3, %v312_v24, %v310_v18  ;;  %v314_v27 = vsel %vm313_vm3, %v310_v18, %v312_v24 }
 0x10c   : > { %v323_v19 = vpop.permute.xlu1 %322 }
 0x114   : > { %v325_v21 = vpop.permute.xlu1 %324 }
 0x115   : > { %v327_v22 = vsel %vm286_vm1, %v323_v19, %v325_v21  ;;  %v328_v23 = vsel %vm286_vm1, %v325_v21, %v323_v19 }
 0x116   : > { %607 = vmatpush.msk.msra.mxu0 %vm286_vm1, %v327_v22  ;;  %611 = vmatpush.msk.msra.mxu1 %vm287_vm2, %v328_v23 }
 0x118   : > { %356 = vmatpush.msra.mxu0 %v305_v11  ;;  %379 = vmatpush.msra.mxu1 %v306_v12 }
 0x11a   : > { %608 = vmatpush.msk.msra.mxu0 %vm284_vm4, %v315_v26  ;;  %612 = vmatpush.msk.msra.mxu1 %vm285_vm5, %v314_v27 }
 0x11b   : > { %609 = vmatmul.msk.f32.vlgmr.msra.gmra.mxu0 %vm335_vm6, %v307_v25  ;;  %613 = vmatmul.msk.f32.vlgmr.msra.gmra.mxu1 %vm335_vm6, %v307_v25 }
 0x11e   : > { %v418_v29 = vpop.f32.mrf.mxu2  ;;  %v441_v30 = vpop.f32.mrf.mxu3 }
 0x11f   : > { %447 = vst [vmem:[%s246_s14] sm:$0xff] %v418_v29 }
 0x120   : > { %448 = vst [vmem:[%s246_s14 + $0x8] sm:$0xff] %v441_v30 }
 0x123   : > { %610 = vmatmul.msk.f32.gmra.mxu0 %vm335_vm6, %v308_v28  ;;  %614 = vmatmul.msk.f32.gmra.mxu1 %vm335_vm6, %v308_v28 }
 0x126   : > { %v421_v31 = vpop.f32.mrf.mxu2  ;;  %v444_v32 = vpop.f32.mrf.mxu3 }
 0x127   : > { %449 = vst [vmem:[%s246_s14 + $0x10] sm:$0xff] %v421_v31 }
 0x128   : > { %450 = vst [vmem:[%s246_s14 + $0x18] sm:$0xff] %v444_v32 }
 0x129   : > { %750 = shalt.err (!%p747_p8)
}
 0x12a   : > { %s829_s14 = smov 256   ;;  %s830_s16 = smov 512  }
 0x12b   : > { %s831_s17 = smov 16   ;;  %s239_s30 = scalar_lea.vmem [#allocation5], %s602_s12 }
 0x12c   : > { %634 = dma.vmem_to_hbm [thread:$0]  (%p900_p5), %s487_s23, 512, %s489_s25, %s457_s26, %s829_s14, %s830_s16, %s831_s17  }
 0x12d   : > { %s468_s8 = scalar_lea.hbm %s1004_s4, %s627_s13  ;;  %s469_s9 = sshll.u32 %s239_s30, 4  ;;  %s470_s9 = int_to_ptr.vmem [resolvable:$true] %s469_s9 }
 0x12e   : > { %s471_s10 = sshll.u32 %s468_s8, 4  ;;  %s452_s23 = scalar_lea.sflag [#allocation4], %s937_s11  ;;  %s472_s10 = int_to_ptr.hbm [resolvable:$true] %s471_s10 }
 0x12f   : > { %s765_s25 = sshra.s32 %s472_s10, 4  ;;  %s771_s13 = scalar_lea.hbm %s1004_s4, 64  ;;  %s766_s25 = int_to_ptr.hbm [resolvable:$true] %s765_s25 }
 0x130   : > { %s767_s12 = scalar_lea.hbm %s766_s25, 32  ;;  %p772_p12 = scmp.lt.s32.totalorder %s766_s25, %s1004_s4 }
 0x131   : > { %p768_p9 = scmp.ne.s32.totalorder %s766_s25, %s767_s12  ;;  %p773_p13 = scmp.lt.s32.totalorder %s771_s13, %s767_s12 }
 0x133   : > { %p769_p10 = pnand %p768_p9, %p900_p5  ;;  %p774_p0 = por %p773_p13, %p772_p12 }
 0x135   : > { %p770_p11 = pneg %p769_p10 }
 0x137   : > { %p775_p1 = pnand %p774_p0, %p770_p11 }
 0x198   : > { %v359_v33 = vpop.f32.mrf.mxu0  ;;  %v382_v34 = vpop.f32.mrf.mxu1 }
 0x199   : > { %388 = vst [vmem:[%s239_s30] sm:$0xff] %v359_v33 }
 0x19a   : > { %389 = vst [vmem:[%s239_s30 + $0x8] sm:$0xff] %v382_v34 }
 0x1a0   : > { %v362_v35 = vpop.f32.mrf.mxu0  ;;  %v385_v36 = vpop.f32.mrf.mxu1 }
 0x1a1   : > { %390 = vst [vmem:[%s239_s30 + $0x10] sm:$0xff] %v362_v35 }
 0x1a2   : > { %391 = vst [vmem:[%s239_s30 + $0x18] sm:$0xff] %v385_v36 }
 0x1a3   : > { %778 = shalt.err (!%p775_p1)
}
 0x1a4   : > { %633 = dma.vmem_to_hbm [thread:$0]  (%p900_p5), %s470_s9, 512, %s472_s10, %s452_s23, %s829_s14, %s830_s16, %s831_s17  }
 0x1a5 PF: > { %p650_p2 = scmp.ge.s32.totalorder %s821_s21, 2  ;;  %s503_s11 = sand.u32 1, %s809_s18  }
 0x1a6   : > { %s504_s30 = scalar_lea.sflag [#allocation4], %s503_s11 }
 0x1a7   : > { %p642_p3 = pnand %p650_p2, %p904_p6 }
 0x1a9   : > { %p643_p4 = pneg %p642_p3 }
 0x1ab   : > { %800 = dma.done.wait (%p643_p4), %s504_s30, 512  }
 0x1ac   : > { %802 = vsyncadd (%p643_p4), %s504_s30, 4294966784  ;;  %s514_s7 = scalar_lea.sflag [#allocation7], %s503_s11 }
 0x1ad   : > { %804 = dma.done.wait (%p643_p4), %s514_s7, 512  }
 0x1ae   : > { %806 = vsyncadd (%p643_p4), %s514_s7, 4294966784  ;;  %p20_p5 = scmp.ge.s32.totalorder %s887_s24, 4   ;;  %s1008_s18 = smov %s813_s19 }
 0x1af   : > { %s1009_s19 = smov %s817_s20  ;;  %s1010_s20 = smov %s898_s27 }
 0x1b0   : > { %s1011_s21 = smov %s887_s24  ;;  %22 = sbr.rel (!%p20_p5) target bundleno = 6 (0x6), region = 94 }
 0x1b5   :  { %520 = vsyncpa [#allocation3], 1 }
 0x1b6   :  { %522 = vsyncpa [#allocation3 + $0x1], 1 }
 0x1b7   :  { %523 = vsyncpa [#allocation4], 1 }
 0x1b8   :  { %525 = vsyncpa [#allocation4 + $0x1], 1 }
 0x1b9   :  { %526 = vsyncpa [#allocation7], 1 }
 0x1ba   :  { %528 = vsyncpa [#allocation7 + $0x1], 1 }

</bundles_post_ra>
